<compile_context>
chip_gen: v7x
topology: tpu7x:2x2x1
jax: 0.10.0
libtpu: 0.0.40
codegen_flags: <defaults>
</compile_context>

<pallas_src>
import jax
import jax.numpy as jnp
from jax.experimental import pallas as pl
from jax.experimental.pallas import tpu as pltpu

_LANE = 128      # TPU lane width (last dim)
_SUBLANE = 8     # TPU sublane width (second-to-last dim)


def _round_up(x, m):
    return (x + m - 1) // m * m


def _policy_kernel(x_ref, w1_ref, w2_ref, wm_ref, bh_ref, va_ref, o_ref):
    # in-kernel f32 -> bf16 cast (hidden under MXU/DMA slack)
    x = x_ref[...].astype(jnp.bfloat16)
    # layer 1: relu(x @ W1 + b1) -- bf16 MXU operands, f32 accumulation
    h1 = jnp.dot(x, w1_ref[...], preferred_element_type=jnp.float32)
    h1 = jnp.maximum(h1 + bh_ref[0:1, :], 0.0)
    # layer 2: relu(h1 @ W2 + b2)
    h2 = jnp.dot(h1.astype(jnp.bfloat16), w2_ref[...],
                 preferred_element_type=jnp.float32)
    h2 = jnp.maximum(h2 + bh_ref[1:2, :], 0.0)
    # mean head: tanh(h2 @ Wm + bm) * scale + bias  (bm/scale/bias packed in va)
    m = jnp.dot(h2.astype(jnp.bfloat16), wm_ref[...],
                preferred_element_type=jnp.float32)
    m = jnp.tanh(m + va_ref[0:1, :])
    o_ref[...] = (m * va_ref[1:2, :] + va_ref[2:3, :]).astype(o_ref.dtype)


def prepare_params(params):
    """One-time: pad H/A feature dims to 128-lane multiples, cast weights to bf16,
    and pack the two hidden-layer biases into one (2, Hp) array.

    The input-feature axis K is NOT padded (the MXU pads a short contraction dim
    internally for free).  Zero padding on H/A is exact: padded weight columns and
    zero bias padding produce zero activations downstream.
    """
    w1, b1 = params["w1"], params["b1"]   # [K, H], [1, H]
    w2, b2 = params["w2"], params["b2"]   # [H, H], [1, H]
    wm, bm = params["wm"], params["bm"]   # [H, A], [1, A]
    K, H = w1.shape
    A = wm.shape[1]
    Hp, Ap = _round_up(H, _LANE), _round_up(A, _LANE)

    def pad2(a, r, c):
        return jnp.pad(a, ((0, r - a.shape[0]), (0, c - a.shape[1])))

    bh = jnp.concatenate([pad2(b1.reshape(1, -1), 1, Hp),
                          pad2(b2.reshape(1, -1), 1, Hp)], axis=0)  # (2, Hp)
    return {
        "w1": pad2(w1, K, Hp).astype(jnp.bfloat16),   # (K , Hp) -- K unpadded
        "w2": pad2(w2, Hp, Hp).astype(jnp.bfloat16),  # (Hp, Hp)
        "wm": pad2(wm, Hp, Ap).astype(jnp.bfloat16),  # (Hp, Ap)
        "bh": bh.astype(jnp.float32),                 # (2 , Hp)  rows = b1, b2
        "bm": pad2(bm.reshape(1, -1), 1, Ap).astype(jnp.float32),   # (1, Ap)
        "dims": (K, H, A, Hp, Ap),
    }


def _choose_tile(B, tile_b):
    """Batch tile: small batches get one sublane-aligned tile; larger batches get
    256-row-multiple tiles with >= 2 grid steps (so v7x can use both TCs),
    capped at tile_b."""
    if B <= 256:
        return _round_up(max(B, 1), _SUBLANE)
    tb = _round_up(pl.cdiv(B, 2), 256)
    return min(tb, tile_b)


def deterministic_policy_forward(state, prepared, action_scale=1.0, action_bias=0.0,
                                 tile_b=1024, out_dtype=jnp.float32,
                                 return_padded=False):
    """state: [B, num_inputs] (f32). prepared: output of prepare_params.
    action_scale / action_bias: scalar or per-action-dim vector.
    return_padded=True returns the lane-dense (Bp, Ap) buffer (no slice copy)."""
    K, H, A, Hp, Ap = prepared["dims"]
    B = state.shape[0]
    assert state.shape[1] == K

    # bm / scale / bias packed into one (3, Ap) vector operand; padded action
    # lanes get scale=0, bias=0 so they stay exactly zero.
    scale = jnp.broadcast_to(jnp.asarray(action_scale, jnp.float32).reshape(-1), (A,))
    bias = jnp.broadcast_to(jnp.asarray(action_bias, jnp.float32).reshape(-1), (A,))
    scale = jnp.pad(scale, (0, Ap - A)).reshape(1, Ap)
    bias = jnp.pad(bias, (0, Ap - A)).reshape(1, Ap)
    va = jnp.concatenate([prepared["bm"], scale, bias], axis=0)   # (3, Ap)

    tb = _choose_tile(B, tile_b)
    Bp = _round_up(B, tb)
    x = state.astype(jnp.float32)
    if Bp != B:
        x = jnp.pad(x, ((0, Bp - B), (0, 0)))    # batch pad only; K left unpadded

    # Explicit VMEM budget: double-buffered activation tiles + (double-buffered)
    # resident weights + headroom.  Safe on v5e/v6e/v7x at these sizes.
    # TODO(synk): for hidden_dim >~ 4K, add a K-grid over the weight contraction
    # so double-buffered W2 does not exceed v7x's 64 MiB physical VMEM.
    out_itemsize = jnp.dtype(out_dtype).itemsize
    w_bytes = (K * Hp + Hp * Hp + Hp * Ap) * 2           # bf16 weights
    vec_bytes = (2 * Hp + 3 * Ap) * 4
    tile_bytes = tb * K * 4 + tb * Ap * out_itemsize
    vmem_limit = min(max(2 * (w_bytes + vec_bytes + tile_bytes) + (2 << 20),
                         8 << 20), 64 << 20)

    const = lambda i: (0, 0)
    out = pl.pallas_call(
        _policy_kernel,
        out_shape=jax.ShapeDtypeStruct((Bp, Ap), out_dtype),
        grid=(Bp // tb,),
        in_specs=[
            pl.BlockSpec((tb, K), lambda i: (i, 0)),    # state tile (pipelined, f32)
            pl.BlockSpec((K, Hp), const),               # W1 (VMEM-resident)
            pl.BlockSpec((Hp, Hp), const),              # W2
            pl.BlockSpec((Hp, Ap), const),              # Wm
            pl.BlockSpec((2, Hp), const),               # [b1; b2]
            pl.BlockSpec((3, Ap), const),               # [bm; scale; bias]
        ],
        out_specs=pl.BlockSpec((tb, Ap), lambda i: (i, 0)),
        compiler_params=pltpu.CompilerParams(
            dimension_semantics=("parallel",),          # shard batch tiles across TCs
            vmem_limit_bytes=vmem_limit,
        ),
    )(x, prepared["w1"], prepared["w2"], prepared["wm"], prepared["bh"], va)

    if return_padded:
        return out            # consumer indexes [:B, :A]; skips the slice copy
    return out[:B, :A]


def init_params(key, num_inputs, num_actions, hidden_dim):
    """Xavier-uniform weights (gain=1), zero biases, matching weights_init_."""
    def xavier(k, fan_in, fan_out):
        limit = jnp.sqrt(6.0 / (fan_in + fan_out))
        # stored as [in, out] (transpose of PyTorch's [out, in]); same distribution
        return jax.random.uniform(k, (fan_in, fan_out), jnp.float32, -limit, limit)

    k1, k2, k3 = jax.random.split(key, 3)
    return {
        "w1": xavier(k1, num_inputs, hidden_dim),
        "b1": jnp.zeros((1, hidden_dim), jnp.float32),
        "w2": xavier(k2, hidden_dim, hidden_dim),
        "b2": jnp.zeros((1, hidden_dim), jnp.float32),
        "wm": xavier(k3, hidden_dim, num_actions),
        "bm": jnp.zeros((1, num_actions), jnp.float32),
    }


def _reference_forward(state, params, action_scale=1.0, action_bias=0.0):
    # Mirrors kernel numerics: bf16 matmul operands, f32 accumulation/elementwise.
    # NOTE: the PyTorch module runs f32 end-to-end; parity with it is ~1e-2 level.
    def mm(a, w):
        return jnp.dot(a.astype(jnp.bfloat16), w.astype(jnp.bfloat16),
                       preferred_element_type=jnp.float32)
    scale = jnp.asarray(action_scale, jnp.float32)
    bias = jnp.asarray(action_bias, jnp.float32)
    x = jnp.maximum(mm(state, params["w1"]) + params["b1"], 0.0)
    x = jnp.maximum(mm(x, params["w2"]) + params["b2"], 0.0)
    return jnp.tanh(mm(x, params["wm"]) + params["bm"]) * scale + bias


if __name__ == "__main__":
    batch = 2
    num_inputs = 16
    num_actions = 8
    hidden_dim = 32

    key = jax.random.PRNGKey(0)
    k_params, k_state = jax.random.split(key)

    params = init_params(k_params, num_inputs, num_actions, hidden_dim)
    prepared = prepare_params(params)
    state = jax.random.normal(k_state, (batch, num_inputs), jnp.float32)

    # action_space is None in the module default -> scale=1.0, bias=0.0
    mean = deterministic_policy_forward(state, prepared,
                                        action_scale=1.0, action_bias=0.0)
    mean = jax.block_until_ready(mean)
    ref = _reference_forward(state, params)
    assert mean.shape == (batch, num_actions)
    assert jnp.allclose(mean, ref, atol=1e-3, rtol=1e-3), \
        float(jnp.max(jnp.abs(mean - ref)))

    # Larger, non-multiple batch: exercises >=2 grid steps ("parallel" axis),
    # batch padding, and a non-trivial per-action scale/bias.
    a_scale = jnp.linspace(0.5, 2.0, num_actions)
    a_bias = jnp.linspace(-0.1, 0.1, num_actions)
    big_state = jax.random.normal(k_state, (1000, num_inputs), jnp.float32)
    big = jax.block_until_ready(
        deterministic_policy_forward(big_state, prepared,
                                     action_scale=a_scale, action_bias=a_bias))
    big_ref = _reference_forward(big_state, params, a_scale, a_bias)
    assert big.shape == (1000, num_actions)
    assert jnp.allclose(big, big_ref, atol=1e-3, rtol=1e-3)

    # Padded-output path (consumer-side indexing; no slice copy kernel).
    padded = jax.block_until_ready(
        deterministic_policy_forward(big_state, prepared,
                                     action_scale=a_scale, action_bias=a_bias,
                                     return_padded=True))
    assert jnp.allclose(padded[:1000, :num_actions], big_ref, atol=1e-3, rtol=1e-3)

    print("KERNEL_OK")
</pallas_src>

<mosaic_0001>
module attributes {stable_mosaic.version = 11 : i64} {
  func.func @_policy_kernel(%arg0: i32, %arg1: memref<8x16xf32, #tpu.memory_space<vmem>>, %arg2: memref<16x128xbf16, #tpu.memory_space<vmem>>, %arg3: memref<128x128xbf16, #tpu.memory_space<vmem>>, %arg4: memref<128x128xbf16, #tpu.memory_space<vmem>>, %arg5: memref<2x128xf32, #tpu.memory_space<vmem>>, %arg6: memref<3x128xf32, #tpu.memory_space<vmem>>, %arg7: memref<8x128xf32, #tpu.memory_space<vmem>>) attributes {dimension_semantics = [#tpu.dimension_semantics<parallel>], iteration_bounds = array<i64: 1>, scalar_prefetch = 0 : i64, scratch_operands = 0 : i64, tpu.core_type = #tpu.core_type<tc>, window_params = [{transform_indices = @transform_0, window_bounds = array<i64: 8, 16>}, {pipeline_mode = #tpu.pipeline_mode<synchronous>, transform_indices = @transform_1, window_bounds = array<i64: 16, 128>}, {pipeline_mode = #tpu.pipeline_mode<synchronous>, transform_indices = @transform_2, window_bounds = array<i64: 128, 128>}, {pipeline_mode = #tpu.pipeline_mode<synchronous>, transform_indices = @transform_3, window_bounds = array<i64: 128, 128>}, {pipeline_mode = #tpu.pipeline_mode<synchronous>, transform_indices = @transform_4, window_bounds = array<i64: 2, 128>}, {pipeline_mode = #tpu.pipeline_mode<synchronous>, transform_indices = @transform_5, window_bounds = array<i64: 3, 128>}, {transform_indices = @transform_6, window_bounds = array<i64: 8, 128>}]} {
    %c0 = arith.constant 0 : index
    %c0_0 = arith.constant 0 : index
    %0 = vector.load %arg1[%c0, %c0_0] : memref<8x16xf32, #tpu.memory_space<vmem>>, vector<8x16xf32>
    %1 = arith.truncf %0 : vector<8x16xf32> to vector<8x16xbf16>
    %c0_1 = arith.constant 0 : index
    %c0_2 = arith.constant 0 : index
    %2 = vector.load %arg2[%c0_1, %c0_2] : memref<16x128xbf16, #tpu.memory_space<vmem>>, vector<16x128xbf16>
    %cst = arith.constant dense<0.000000e+00> : vector<8x128xf32>
    %3 = tpu.matmul %1, %2, %cst {dimension_numbers = #tpu.dot_dimension_numbers<[1], [0], [0], [1], [0, 0, 1, 1], [], []>} : vector<8x16xbf16>, vector<16x128xbf16>, vector<8x128xf32> -> vector<8x128xf32>
    %c0_3 = arith.constant 0 : index
    %c0_4 = arith.constant 0 : index
    %4 = vector.load %arg5[%c0_3, %c0_4] : memref<2x128xf32, #tpu.memory_space<vmem>>, vector<1x128xf32>
    %5 = vector.broadcast %4 : vector<1x128xf32> to vector<8x128xf32>
    %6 = arith.addf %3, %5 : vector<8x128xf32>
    %cst_5 = arith.constant 0.000000e+00 : f32
    %7 = vector.broadcast %cst_5 : f32 to vector<8x128xf32>
    %8 = arith.maximumf %6, %7 : vector<8x128xf32>
    %9 = arith.truncf %8 : vector<8x128xf32> to vector<8x128xbf16>
    %c0_6 = arith.constant 0 : index
    %c0_7 = arith.constant 0 : index
    %10 = vector.load %arg3[%c0_6, %c0_7] : memref<128x128xbf16, #tpu.memory_space<vmem>>, vector<128x128xbf16>
    %cst_8 = arith.constant dense<0.000000e+00> : vector<8x128xf32>
    %11 = tpu.matmul %9, %10, %cst_8 {dimension_numbers = #tpu.dot_dimension_numbers<[1], [0], [0], [1], [0, 0, 1, 1], [], []>} : vector<8x128xbf16>, vector<128x128xbf16>, vector<8x128xf32> -> vector<8x128xf32>
    %c1 = arith.constant 1 : index
    %c0_9 = arith.constant 0 : index
    %12 = vector.load %arg5[%c1, %c0_9] : memref<2x128xf32, #tpu.memory_space<vmem>>, vector<1x128xf32>
    %13 = vector.broadcast %12 : vector<1x128xf32> to vector<8x128xf32>
    %14 = arith.addf %11, %13 : vector<8x128xf32>
    %cst_10 = arith.constant 0.000000e+00 : f32
    %15 = vector.broadcast %cst_10 : f32 to vector<8x128xf32>
    %16 = arith.maximumf %14, %15 : vector<8x128xf32>
    %17 = arith.truncf %16 : vector<8x128xf32> to vector<8x128xbf16>
    %c0_11 = arith.constant 0 : index
    %c0_12 = arith.constant 0 : index
    %18 = vector.load %arg4[%c0_11, %c0_12] : memref<128x128xbf16, #tpu.memory_space<vmem>>, vector<128x128xbf16>
    %cst_13 = arith.constant dense<0.000000e+00> : vector<8x128xf32>
    %19 = tpu.matmul %17, %18, %cst_13 {dimension_numbers = #tpu.dot_dimension_numbers<[1], [0], [0], [1], [0, 0, 1, 1], [], []>} : vector<8x128xbf16>, vector<128x128xbf16>, vector<8x128xf32> -> vector<8x128xf32>
    %c0_14 = arith.constant 0 : index
    %c0_15 = arith.constant 0 : index
    %20 = vector.load %arg6[%c0_14, %c0_15] : memref<3x128xf32, #tpu.memory_space<vmem>>, vector<1x128xf32>
    %21 = vector.broadcast %20 : vector<1x128xf32> to vector<8x128xf32>
    %22 = arith.addf %19, %21 : vector<8x128xf32>
    %23 = math.tanh %22 : vector<8x128xf32>
    %c1_16 = arith.constant 1 : index
    %c0_17 = arith.constant 0 : index
    %24 = vector.load %arg6[%c1_16, %c0_17] : memref<3x128xf32, #tpu.memory_space<vmem>>, vector<1x128xf32>
    %25 = vector.broadcast %24 : vector<1x128xf32> to vector<8x128xf32>
    %26 = arith.mulf %23, %25 : vector<8x128xf32>
    %c2 = arith.constant 2 : index
    %c0_18 = arith.constant 0 : index
    %27 = vector.load %arg6[%c2, %c0_18] : memref<3x128xf32, #tpu.memory_space<vmem>>, vector<1x128xf32>
    %28 = vector.broadcast %27 : vector<1x128xf32> to vector<8x128xf32>
    %29 = arith.addf %26, %28 : vector<8x128xf32>
    %c0_19 = arith.constant 0 : index
    %c0_20 = arith.constant 0 : index
    %30 = vector.load %arg7[%c0_19, %c0_20] : memref<8x128xf32, #tpu.memory_space<vmem>>, vector<8x128xf32>
    tpu.vector_store %arg7[%c0_19, %c0_20], %29 {strides = array<i32>} : memref<8x128xf32, #tpu.memory_space<vmem>>, vector<8x128xf32>,
    return
  }
  func.func @transform_0(%arg0: i32) -> (i32, i32) {
    %c0_i32 = arith.constant 0 : i32
    %c0_i32_0 = arith.constant 0 : i32
    return %arg0, %c0_i32 : i32, i32
  }
  func.func @transform_1(%arg0: i32) -> (i32, i32) {
    %c0_i32 = arith.constant 0 : i32
    %c0_i32_0 = arith.constant 0 : i32
    %c0_i32_1 = arith.constant 0 : i32
    return %c0_i32, %c0_i32_0 : i32, i32
  }
  func.func @transform_2(%arg0: i32) -> (i32, i32) {
    %c0_i32 = arith.constant 0 : i32
    %c0_i32_0 = arith.constant 0 : i32
    %c0_i32_1 = arith.constant 0 : i32
    return %c0_i32, %c0_i32_0 : i32, i32
  }
  func.func @transform_3(%arg0: i32) -> (i32, i32) {
    %c0_i32 = arith.constant 0 : i32
    %c0_i32_0 = arith.constant 0 : i32
    %c0_i32_1 = arith.constant 0 : i32
    return %c0_i32, %c0_i32_0 : i32, i32
  }
  func.func @transform_4(%arg0: i32) -> (i32, i32) {
    %c0_i32 = arith.constant 0 : i32
    %c0_i32_0 = arith.constant 0 : i32
    %c0_i32_1 = arith.constant 0 : i32
    return %c0_i32, %c0_i32_0 : i32, i32
  }
  func.func @transform_5(%arg0: i32) -> (i32, i32) {
    %c0_i32 = arith.constant 0 : i32
    %c0_i32_0 = arith.constant 0 : i32
    %c0_i32_1 = arith.constant 0 : i32
    return %c0_i32, %c0_i32_0 : i32, i32
  }
  func.func @transform_6(%arg0: i32) -> (i32, i32) {
    %c0_i32 = arith.constant 0 : i32
    %c0_i32_0 = arith.constant 0 : i32
    return %arg0, %c0_i32 : i32, i32
  }
}

</mosaic_0001>

<bundles_post_ra>
// kernel: tpu_custom_call.1
= control target key start
LH: loop header
LB: loop body
LE: loop exit
PB: predicated region body
PF: predicated region fallthrough
CT: control target
= control target key end

     0   :  { %11 = vsyncpa [#allocation3], 0  ;;  %s773_s0 = inlined_call_operand.hbm [shape: f32[8,16], index: 0, kind: input, shape index: {}]   ;;  %s774_s1 = inlined_call_operand.hbm [shape: bf16[16,128], index: 1, kind: input, shape index: {}]   ;;  %s775_s2 = inlined_call_operand.hbm [shape: bf16[128,128], index: 2, kind: input, shape index: {}]   ;;  %s776_s3 = inlined_call_operand.hbm [shape: bf16[128,128], index: 3, kind: input, shape index: {}]   ;;  %s777_s4 = inlined_call_operand.vmem [shape: f32[2,128], index: 4, kind: input, shape index: {}]   ;;  %s778_s5 = inlined_call_operand.vmem [shape: f32[3,128], index: 5, kind: input, shape index: {}]   ;;  %s779_s6 = inlined_call_operand.hbm [shape: f32[8,128], index: 6, kind: output, shape index: {}]  }
   0x1   :  { %12 = vsyncpa [#allocation6], 0 }
   0x2   :  { %13 = vsyncpa [#allocation9], 0 }
   0x3   :  { %14 = vsyncpa [#allocation4], 0  ;;  %s625_s21 = smov [#allocation5]   ;;  %s507_s25 = scalar_lea.hbm %s774_s1, 128 }
   0x4   :  { %s30_s22 = sshll.u32 %s625_s21, 4  ;;  %p508_p0 = scmp.ne.s32.totalorder %s774_s1, %s507_s25  ;;  %s31_s22 = int_to_ptr.vmem [resolvable:$true] %s30_s22 }
   0x5   :  { %p511_p1 = scmp.lt.u32.totalorder %s507_s25, %s774_s1 }
   0x7   :  { %p513_p2 = pnand %p511_p1, %p508_p0 }
   0x9   :  { %516 = shalt.err (!%p513_p2)
}
   0xa   :  { %s517_s30 = scalar_lea.vmem %s31_s22, 128  ;;  %p522_p4 = scmp.lt.s32.totalorder %s31_s22, %s31_s22 }
   0xb   :  { %p518_p3 = scmp.ne.s32.totalorder %s31_s22, %s517_s30  ;;  %p523_p5 = scmp.lt.s32.totalorder %s517_s30, %s517_s30 }
   0xd   :  { %p524_p6 = por %p523_p5, %p522_p4 }
   0xf   :  { %p525_p7 = pnand %p524_p6, %p518_p3 }
  0x11   :  { %528 = shalt.err (!%p525_p7)
}
  0x12   :  { %s626_s7 = smov 64   ;;  %s627_s8 = smov 4  }
  0x13   :  { %36 = dma.hbm_to_vmem [thread:$0]  %s774_s1, 128, %s31_s22, [#allocation6], %s626_s7, %s626_s7, %s627_s8  }
  0x14   :  { %s628_s11 = smov [#allocation2]   ;;  %s629_s13 = smov [#allocation7]  }
  0x15   :  { %s21_s12 = sshll.u32 %s628_s11, 4  ;;  %s42_s14 = sshll.u32 %s629_s13, 4  ;;  %s22_s12 = int_to_ptr.vmem [resolvable:$true] %s21_s12  ;;  %s43_s14 = int_to_ptr.vmem [resolvable:$true] %s42_s14 }
  0x16   :  { %s529_s17 = scalar_lea.hbm %s773_s0, 128 }
  0x17   :  { %p530_p8 = scmp.ne.s32.totalorder %s773_s0, %s529_s17  ;;  %p533_p9 = scmp.lt.u32.totalorder %s529_s17, %s773_s0 }
  0x19   :  { %p535_p10 = pnand %p533_p9, %p530_p8 }
  0x1b   :  { %538 = shalt.err (!%p535_p10)
}
  0x1c   :  { %s539_s1 = scalar_lea.vmem %s22_s12, 128  ;;  %p544_p12 = scmp.lt.s32.totalorder %s22_s12, %s22_s12 }
  0x1d   :  { %p540_p11 = scmp.ne.s32.totalorder %s22_s12, %s539_s1  ;;  %p545_p13 = scmp.lt.s32.totalorder %s539_s1, %s539_s1 }
  0x1f   :  { %p546_p0 = por %p545_p13, %p544_p12 }
  0x21   :  { %p547_p1 = pnand %p546_p0, %p540_p11 }
  0x23   :  { %550 = shalt.err (!%p547_p1)
}
  0x24   :  { %24 = dma.hbm_to_vmem [thread:$0]  %s773_s0, 128, %s22_s12, [#allocation3]  }
  0x25   :  { %s551_s26 = scalar_lea.hbm %s775_s2, 1024 }
  0x26   :  { %p552_p2 = scmp.ne.s32.totalorder %s775_s2, %s551_s26  ;;  %p555_p3 = scmp.lt.u32.totalorder %s551_s26, %s775_s2 }
  0x28   :  { %p557_p4 = pnand %p555_p3, %p552_p2 }
  0x2a   :  { %560 = shalt.err (!%p557_p4)
}
  0x2b   :  { %s561_s9 = scalar_lea.vmem %s43_s14, 1024  ;;  %p566_p6 = scmp.lt.s32.totalorder %s43_s14, %s43_s14 }
  0x2c   :  { %p562_p5 = scmp.ne.s32.totalorder %s43_s14, %s561_s9  ;;  %p567_p7 = scmp.lt.s32.totalorder %s561_s9, %s561_s9 }
  0x2e   :  { %p568_p8 = por %p567_p7, %p566_p6 }
  0x30   :  { %p569_p9 = pnand %p568_p8, %p562_p5 }
  0x32   :  { %572 = shalt.err (!%p569_p9)
}
  0x33   :  { %48 = dma.hbm_to_vmem [thread:$0]  %s775_s2, 1024, %s43_s14, [#allocation6], %s626_s7, %s626_s7, %s627_s8  }
  0x34   :  { %s630_s11 = smov [#allocation8]   ;;  %s573_s16 = scalar_lea.hbm %s776_s3, 1024 }
  0x35   :  { %s54_s12 = sshll.u32 %s630_s11, 4  ;;  %p574_p10 = scmp.ne.s32.totalorder %s776_s3, %s573_s16  ;;  %s55_s12 = int_to_ptr.vmem [resolvable:$true] %s54_s12 }
  0x36   :  { %p577_p11 = scmp.lt.u32.totalorder %s573_s16, %s776_s3 }
  0x38   :  { %p579_p12 = pnand %p577_p11, %p574_p10 }
  0x3a   :  { %582 = shalt.err (!%p579_p12)
}
  0x3b   :  { %s583_s21 = scalar_lea.vmem %s55_s12, 1024  ;;  %p588_p0 = scmp.lt.s32.totalorder %s55_s12, %s55_s12 }
  0x3c   :  { %p584_p13 = scmp.ne.s32.totalorder %s55_s12, %s583_s21  ;;  %p589_p1 = scmp.lt.s32.totalorder %s583_s21, %s583_s21 }
  0x3e   :  { %p590_p2 = por %p589_p1, %p588_p0 }
  0x40   :  { %p591_p3 = pnand %p590_p2, %p584_p13 }
  0x42   :  { %594 = shalt.err (!%p591_p3)
}
  0x43   :  { %60 = dma.hbm_to_vmem [thread:$0]  %s776_s3, 1024, %s55_s12, [#allocation9], %s626_s7, %s626_s7, %s627_s8  }
  0x44   :  { %617 = dma.done.wait [#allocation3], 128  }
  0x45   :  { %618 = vsyncadd [#allocation3], 4294967168 }
  0x46   :  { %619 = dma.done.wait [#allocation6], 1152  }
  0x47   :  { %620 = vsyncadd [#allocation6], 4294966144 }
  0x48   :  { %621 = dma.done.wait [#allocation9], 1024  }
  0x49   :  { %622 = vsyncadd [#allocation9], 4294966272  ;;  %v631_v0 = vmov 0.0   ;;  %vm632_vm0 = vmmov 0   ;;  %v488_v1 = vld [vmem:[#allocation5] sm:$0xff]   ;;  %v78_v2 = vld [vmem:[#allocation2] sm:$0xff] }
  0x4a   :  { %433 = vmatprep.subr.bf16.mxu0 %v631_v0  ;;  %435 = vmatprep.mubr.msk.bf16.mxu0 %vm632_vm0, %v631_v0  ;;  %v79_v3 = vpack.c.bf16 %v78_v2, %v78_v2  ;;  %vm93_vm1 = vcmask 130048   ;;  %v489_v4 = vld [vmem:[#allocation7] sm:$0xff]   ;;  %v490_v5 = vld [vmem:[#allocation7 + $0x8] sm:$0xff]   ;;  %v491_v6 = vld [vmem:[#allocation7 + $0x10] sm:$0xff]   ;;  %s633_s27 = smov [#allocation10]  }
  0x4b   :  { %439 = vmatprep.subr.bf16.mxu1 %v631_v0  ;;  %455 = vmatprep.mubr.msk.bf16.mxu1 %vm632_vm0, %v631_v0  ;;  %v492_v7 = vld [vmem:[#allocation7 + $0x18] sm:$0xff]   ;;  %v493_v8 = vld [vmem:[#allocation7 + $0x20] sm:$0xff]   ;;  %v494_v9 = vld [vmem:[#allocation7 + $0x28] sm:$0xff]   ;;  %s379_s28 = sshll.u32 %s633_s27, 4  ;;  %s380_s28 = int_to_ptr.vmem [resolvable:$true] %s379_s28 }
  0x4c   :  { %434 = vmatpush3.bf16.msra.mxu0 %v488_v1  ;;  %440 = vmatpush3.bf16.msra.mxu1 %v489_v4  ;;  %v495_v10 = vld [vmem:[#allocation7 + $0x30] sm:$0xff]   ;;  %v496_v11 = vld [vmem:[#allocation7 + $0x38] sm:$0xff]   ;;  %v497_v12 = vld [vmem:[#allocation8] sm:$0xff]   ;;  %s595_s29 = scalar_lea.vmem %s380_s28, 128  ;;  %p600_p5 = scmp.lt.s32.totalorder %s380_s28, %s380_s28 }
  0x4d   :  { %459 = vmatprep.subr.bf16.mxu0 %v631_v0  ;;  %441 = vmatprep.subr.bf16.mxu1 %v631_v0  ;;  %v498_v13 = vld [vmem:[#allocation8 + $0x8] sm:$0xff]   ;;  %v499_v14 = vld [vmem:[#allocation8 + $0x10] sm:$0xff]   ;;  %v500_v15 = vld [vmem:[#allocation8 + $0x18] sm:$0xff]   ;;  %p596_p4 = scmp.ne.s32.totalorder %s380_s28, %s595_s29  ;;  %p601_p6 = scmp.lt.s32.totalorder %s595_s29, %s595_s29 }
  0x4e   :  { %v501_v16 = vld [vmem:[#allocation8 + $0x20] sm:$0xff]   ;;  %v502_v17 = vld [vmem:[#allocation8 + $0x28] sm:$0xff]   ;;  %v390_v18 = vld [vmem:[%s777_s4] ss:$0 sm:$0xff] }
  0x4f   :  { %436 = vmatmul.mubr.msk.bf16.vlgmr.msra.gmra.mrb[0].mxu0 %vm93_vm1, %v79_v3  ;;  %v503_v26 = vld [vmem:[#allocation8 + $0x30] sm:$0xff]   ;;  %v504_v27 = vld [vmem:[#allocation8 + $0x38] sm:$0xff]   ;;  %p602_p7 = por %p601_p6, %p600_p5 }
  0x50   :  { %475 = vmatprep.mubr.msk.bf16.mxu0 %vm632_vm0, %v631_v0  ;;  %442 = vmatpush3.bf16.msra.mxu1 %v490_v5  ;;  %v393_v28 = vld [vmem:[%s777_s4 + $0x1] ss:$0 sm:$0xff]  ;;  %v402_v36 = vld [vmem:[%s778_s5] ss:$0 sm:$0xff]  ;;  %v412_v44 = vld [vmem:[%s778_s5 + $0x2] ss:$0 sm:$0xff] }
  0x51   :  { %443 = vmatprep.subr.bf16.mxu1 %v631_v0  ;;  %460 = vmatpush3.bf16.msra.mxu0 %v497_v12  ;;  %v411_v42 = vld [vmem:[%s778_s5 + $0x1] ss:$0 sm:$0xff]  ;;  %p603_p8 = pnand %p602_p7, %p596_p4 }
  0x52   :  { %461 = vmatprep.subr.bf16.mxu0 %v631_v0 }
  0x54   :  { %444 = vmatpush3.bf16.msra.mxu1 %v491_v6 }
  0x55   :  { %445 = vmatprep.subr.bf16.mxu1 %v631_v0  ;;  %462 = vmatpush3.bf16.msra.mxu0 %v498_v13 }
  0x56   :  { %463 = vmatprep.subr.bf16.mxu0 %v631_v0 }
  0x58   :  { %446 = vmatpush3.bf16.msra.mxu1 %v492_v7 }
  0x59   :  { %447 = vmatprep.subr.bf16.mxu1 %v631_v0  ;;  %464 = vmatpush3.bf16.msra.mxu0 %v499_v14 }
  0x5a   :  { %465 = vmatprep.subr.bf16.mxu0 %v631_v0 }
  0x5c   :  { %448 = vmatpush3.bf16.msra.mxu1 %v493_v8 }
  0x5d   :  { %449 = vmatprep.subr.bf16.mxu1 %v631_v0  ;;  %466 = vmatpush3.bf16.msra.mxu0 %v500_v15 }
  0x5e   :  { %467 = vmatprep.subr.bf16.mxu0 %v631_v0 }
  0x60   :  { %450 = vmatpush3.bf16.msra.mxu1 %v494_v9 }
  0x61   :  { %451 = vmatprep.subr.bf16.mxu1 %v631_v0  ;;  %468 = vmatpush3.bf16.msra.mxu0 %v501_v16 }
  0x62   :  { %469 = vmatprep.subr.bf16.mxu0 %v631_v0 }
  0x64   :  { %452 = vmatpush3.bf16.msra.mxu1 %v495_v10 }
  0x65   :  { %453 = vmatprep.subr.bf16.mxu1 %v631_v0  ;;  %470 = vmatpush3.bf16.msra.mxu0 %v502_v17 }
  0x66   :  { %471 = vmatprep.subr.bf16.mxu0 %v631_v0 }
  0x68   :  { %454 = vmatpush3.bf16.msra.mxu1 %v496_v11 }
  0x69   :  { %472 = vmatpush3.bf16.msra.mxu0 %v503_v26 }
  0x6a   :  { %473 = vmatprep.subr.bf16.mxu0 %v631_v0 }
  0x6d   :  { %474 = vmatpush3.bf16.msra.mxu0 %v504_v27 }
 0x122   :  { %v131_v19 = vpop.f32.mrb[0].mxu0 }
 0x123   :  { %v132_v20 = vadd.f32 %v390_v18, %v131_v19  ;;  %v437_v21 = vpop.f32.mrb[1].mxu0 }
 0x124   :  { %v134_v22 = vpop.f32.mrb[2].mxu0 }
 0x125   :  { %v137_v23 = vmax.f32 %v132_v20, 0.0  ;;  %v438_v24 = vpop.f32.mrb[3].mxu0 }
 0x127   :  { %v138_v25 = vpack.c.bf16 %v137_v23, %v137_v23 }
 0x129   :  { %456 = vmatmul.mubr.bf16.vlgmr.msra.gmra.mrb[0].mxu1 %v138_v25 }
 0x1fc   :  { %v242_v29 = vpop.f32.mrb[0].mxu1 }
 0x1fd   :  { %v243_v30 = vadd.f32 %v393_v28, %v242_v29  ;;  %v457_v31 = vpop.f32.mrb[1].mxu1 }
 0x1fe   :  { %v245_v32 = vpop.f32.mrb[2].mxu1 }
 0x1ff   :  { %v248_v33 = vmax.f32 %v243_v30, 0.0  ;;  %v458_v34 = vpop.f32.mrb[3].mxu1 }
 0x201   :  { %v249_v35 = vpack.c.bf16 %v248_v33, %v248_v33 }
 0x203   :  { %476 = vmatmul.mubr.bf16.vlgmr.msra.gmra.mrb[4].mxu0 %v249_v35 }
 0x2d6   :  { %v353_v37 = vpop.f32.mrb[4].mxu0 }
 0x2d7   :  { %v354_v38 = vadd.f32 %v402_v36, %v353_v37  ;;  %v477_v39 = vpop.f32.mrb[5].mxu0 }
 0x2d8   :  { %v356_v40 = vpop.f32.mrb[6].mxu0 }
 0x2d9   :  { %505 = vtanh.f32 %v354_v38  ;;  %v478_v41 = vpop.f32.mrb[7].mxu0 }
 0x2e3   :  { %v506_v43 = vpop.eup %505 }
 0x2e4   :  { %v365_v45 = vmul.f32 %v506_v43, %v411_v42 }
 0x2e6   :  { %v371_v46 = vadd.f32 %v412_v44, %v365_v45 }
 0x2e8   :  { %372 = vst [vmem:[#allocation10] sm:$0xff] %v371_v46 }
 0x2e9   :  { %606 = shalt.err (!%p603_p8)
}
 0x2ea   :  { %s607_s0 = scalar_lea.hbm %s779_s6, 128 }
 0x2eb   :  { %p608_p9 = scmp.ne.s32.totalorder %s779_s6, %s607_s0  ;;  %p611_p10 = scmp.lt.u32.totalorder %s607_s0, %s779_s6 }
 0x2ed   :  { %p613_p11 = pnand %p611_p10, %p608_p9 }
 0x2ef   :  { %616 = shalt.err (!%p613_p11)
}
 0x2f0   :  { %382 = dma.vmem_to_hbm [thread:$0]  %s380_s28, 128, %s779_s6, [#allocation4]  }
 0x2f1   :  { %623 = dma.done.wait [#allocation4], 128  }
 0x2f2   :  { %624 = vsyncadd [#allocation4], 4294967168 }
 0x2f3   :  { %386 = vsyncpa [#allocation3], 1 }
 0x2f4   :  { %387 = vsyncpa [#allocation6], 1 }
 0x2f5   :  { %388 = vsyncpa [#allocation9], 1 }
 0x2f6   :  { %389 = vsyncpa [#allocation4], 1 }

</bundles_post_ra>
